<compile_context>
chip_gen: v7x
topology: tpu7x:2x2x1
jax: 0.10.0
libtpu: 0.0.40
codegen_flags: <defaults>
</compile_context>

<pallas_src>
import jax
import jax.numpy as jnp
from jax.experimental import pallas as pl
from jax.experimental.pallas import tpu as pltpu


def _mlp_tanh_kernel(x_ref, p_ref, o_ref):
    # x_ref: (TILE_N, 1)  input rows (sublane-dense on N)
    # p_ref: (4, H)       packed params: row0=w1, row1=b1, row2=w2, row3[0]=b2
    # o_ref: (TILE_N, 1)  output rows
    x = x_ref[...]                       # (TILE_N, 1)
    w1 = p_ref[0:1, :]                   # (1, H)   static slices: free views
    b1 = p_ref[1:2, :]                   # (1, H)
    w2 = p_ref[2:3, :]                   # (1, H)
    b2 = p_ref[3:4, 0:1]                 # (1, 1)
    # Layer 1: rank-1 "matmul" as VPU broadcast-mul + add, EUP tanh. No MXU.
    h = jnp.tanh(x * w1 + b1)            # (TILE_N, H)
    # Layer 2: weighted lane reduction over H (VPU mul + XLU reduce).
    y = jnp.sum(h * w2, axis=1, keepdims=True)   # (TILE_N, 1)
    o_ref[...] = y + b2


def pack_params(w1, b1, w2, b2):
    """Pack parameters into a single (4, H) f32 array (done once, not per call).

    w1 : (1, H)   b1 : (1, H)   w2 : (H, 1)   b2 : (1, 1)
    """
    H = w1.shape[1]
    b2_row = jnp.zeros((1, H), jnp.float32).at[0, 0].set(b2.reshape(()))
    return jnp.concatenate(
        [w1.reshape(1, H), b1.reshape(1, H), w2.reshape(1, H), b2_row],
        axis=0,
    ).astype(jnp.float32)


def net_tanh_forward(x, packed_params):
    """Pallas forward pass of Net_tanh (D_in == D_out == 1 as in the spec).

    x             : (N, 1) float32
    packed_params : (4, H) float32 from pack_params()
    returns (N, 1) float32; no wrapper-side layout ops at call time.
    """
    N, D_in = x.shape
    four, H = packed_params.shape
    assert D_in == 1 and four == 4, "kernel specialized to D_in == D_out == 1"

    x = x.astype(jnp.float32)

    # Tile the batch axis on sublanes.  <=512 rows per step keeps the (TILE, H)
    # intermediate well inside the 64-vreg file; "parallel" lets v7x shard the
    # grid across its two TensorCores (harmless single-loop on v5e/v6e).
    TILE_N = N if N <= 512 else 512
    grid = (pl.cdiv(N, TILE_N),)

    out = pl.pallas_call(
        _mlp_tanh_kernel,
        out_shape=jax.ShapeDtypeStruct((N, 1), jnp.float32),
        grid=grid,
        in_specs=[
            pl.BlockSpec((TILE_N, 1), lambda i: (i, 0)),
            pl.BlockSpec((4, H), lambda i: (0, 0)),
        ],
        out_specs=pl.BlockSpec((TILE_N, 1), lambda i: (i, 0)),
        compiler_params=pltpu.CompilerParams(
            dimension_semantics=("parallel",),
        ),
    )(x, packed_params)

    return out


def init_params(key, D_in, H, D_out):
    """Deterministic init mirroring torch.nn.Linear default U[-1/sqrt(fan_in), +]."""
    k1, k2, k3, k4 = jax.random.split(key, 4)
    bound1 = 1.0 / jnp.sqrt(jnp.float32(D_in))
    bound2 = 1.0 / jnp.sqrt(jnp.float32(H))
    w1 = jax.random.uniform(k1, (D_in, H), jnp.float32, -bound1, bound1)
    b1 = jax.random.uniform(k2, (1, H), jnp.float32, -bound1, bound1)
    w2 = jax.random.uniform(k3, (H, D_out), jnp.float32, -bound2, bound2)
    b2 = jax.random.uniform(k4, (1, D_out), jnp.float32, -bound2, bound2)
    return w1, b1, w2, b2


if __name__ == "__main__":
    # Shapes implied by the reference script: x = arange(-2, 2, 0.1).view(-1, 1)
    # -> N=40, D_in=1; H=32 hidden units, D_out=1.
    N, D_in, H, D_out = 40, 1, 32, 1

    key = jax.random.PRNGKey(0)
    _, kp = jax.random.split(key)

    x = jnp.arange(-2.0, 2.0, 0.1, dtype=jnp.float32).reshape(-1, 1)
    assert x.shape == (N, D_in)

    w1, b1, w2, b2 = init_params(kp, D_in, H, D_out)

    # Pack once (parameter-setup cost, not a per-forward cost).
    params = jax.block_until_ready(pack_params(w1, b1, w2, b2))

    out = net_tanh_forward(x, params)
    out = jax.block_until_ready(out)

    # Reference check in plain JAX (same math as the torch module).
    ref = jnp.tanh(x @ w1 + b1) @ w2 + b2
    assert out.shape == (N, D_out)
    assert jnp.allclose(out, ref, atol=1e-5, rtol=1e-5)

    print("KERNEL_OK")
</pallas_src>

<mosaic_0001>
module attributes {stable_mosaic.version = 11 : i64} {
  func.func @_mlp_tanh_kernel(%arg0: i32, %arg1: memref<40x1xf32, #tpu.memory_space<vmem>>, %arg2: memref<4x32xf32, #tpu.memory_space<vmem>>, %arg3: memref<40x1xf32, #tpu.memory_space<vmem>>) attributes {dimension_semantics = [#tpu.dimension_semantics<parallel>], iteration_bounds = array<i64: 1>, scalar_prefetch = 0 : i64, scratch_operands = 0 : i64, tpu.core_type = #tpu.core_type<tc>, window_params = [{transform_indices = @transform_0, window_bounds = array<i64: 40, 1>}, {pipeline_mode = #tpu.pipeline_mode<synchronous>, transform_indices = @transform_1, window_bounds = array<i64: 4, 32>}, {transform_indices = @transform_2, window_bounds = array<i64: 40, 1>}]} {
    %c0 = arith.constant 0 : index
    %c0_0 = arith.constant 0 : index
    %0 = vector.load %arg1[%c0, %c0_0] : memref<40x1xf32, #tpu.memory_space<vmem>>, vector<40x1xf32>
    %c0_1 = arith.constant 0 : index
    %c0_2 = arith.constant 0 : index
    %1 = vector.load %arg2[%c0_1, %c0_2] : memref<4x32xf32, #tpu.memory_space<vmem>>, vector<1x32xf32>
    %c1 = arith.constant 1 : index
    %c0_3 = arith.constant 0 : index
    %2 = vector.load %arg2[%c1, %c0_3] : memref<4x32xf32, #tpu.memory_space<vmem>>, vector<1x32xf32>
    %c2 = arith.constant 2 : index
    %c0_4 = arith.constant 0 : index
    %3 = vector.load %arg2[%c2, %c0_4] : memref<4x32xf32, #tpu.memory_space<vmem>>, vector<1x32xf32>
    %c3 = arith.constant 3 : index
    %c0_5 = arith.constant 0 : index
    %4 = vector.load %arg2[%c3, %c0_5] : memref<4x32xf32, #tpu.memory_space<vmem>>, vector<1x1xf32>
    %5 = vector.broadcast %0 : vector<40x1xf32> to vector<40x32xf32>
    %6 = vector.broadcast %1 : vector<1x32xf32> to vector<40x32xf32>
    %7 = arith.mulf %5, %6 : vector<40x32xf32>
    %8 = vector.broadcast %2 : vector<1x32xf32> to vector<40x32xf32>
    %9 = arith.addf %7, %8 : vector<40x32xf32>
    %10 = math.tanh %9 : vector<40x32xf32>
    %11 = vector.broadcast %3 : vector<1x32xf32> to vector<40x32xf32>
    %12 = arith.mulf %10, %11 : vector<40x32xf32>
    %cst = arith.constant dense<0.000000e+00> : vector<40xf32>
    %13 = vector.multi_reduction <add>, %12, %cst [1] : vector<40x32xf32> to vector<40xf32>
    %14 = vector.shape_cast %13 : vector<40xf32> to vector<40x1xf32>
    %15 = vector.broadcast %4 : vector<1x1xf32> to vector<40x1xf32>
    %16 = arith.addf %14, %15 : vector<40x1xf32>
    %c0_6 = arith.constant 0 : index
    %c0_7 = arith.constant 0 : index
    %17 = vector.load %arg3[%c0_6, %c0_7] : memref<40x1xf32, #tpu.memory_space<vmem>>, vector<40x1xf32>
    tpu.vector_store %arg3[%c0_6, %c0_7], %16 {strides = array<i32>} : memref<40x1xf32, #tpu.memory_space<vmem>>, vector<40x1xf32>,
    return
  }
  func.func @transform_0(%arg0: i32) -> (i32, i32) {
    %c0_i32 = arith.constant 0 : i32
    %c0_i32_0 = arith.constant 0 : i32
    return %arg0, %c0_i32 : i32, i32
  }
  func.func @transform_1(%arg0: i32) -> (i32, i32) {
    %c0_i32 = arith.constant 0 : i32
    %c0_i32_0 = arith.constant 0 : i32
    %c0_i32_1 = arith.constant 0 : i32
    return %c0_i32, %c0_i32_0 : i32, i32
  }
  func.func @transform_2(%arg0: i32) -> (i32, i32) {
    %c0_i32 = arith.constant 0 : i32
    %c0_i32_0 = arith.constant 0 : i32
    return %arg0, %c0_i32 : i32, i32
  }
}

</mosaic_0001>

<bundles_post_ra>
// kernel: tpu_custom_call.1
= control target key start
LH: loop header
LB: loop body
LE: loop exit
PB: predicated region body
PF: predicated region fallthrough
CT: control target
= control target key end

     0   :  { %v129_v0 = vmov 0   ;;  %vm77_vm0 = vcmask 261120   ;;  %vm102_vm1 = vcmask 7168   ;;  %s192_s0 = inlined_call_operand.vmem [shape: f32[40,1], index: 0, kind: input, shape index: {}]   ;;  %s193_s1 = inlined_call_operand.vmem [shape: f32[4,32], index: 1, kind: input, shape index: {}]   ;;  %s194_s2 = inlined_call_operand.vmem [shape: f32[40,1], index: 2, kind: output, shape index: {}]  }
   0x1   :  { %117 = vset.pattern.permute.xlu0 %v129_v0  ;;  %v11_v1 = vld [vmem:[%s192_s0] sm:$0xff]  ;;  %118 = vset.pattern.permute.xlu1 %v129_v0  ;;  %v13_v2 = vld [vmem:[%s192_s0 + $0x10] sm:$0xff]  ;;  %v12_v3 = vld [vmem:[%s192_s0 + $0x8] sm:$0xff] }
   0x2   :  { %22 = vperm.xlu0 %117, %v11_v1   ;;  %32 = vperm.xlu1 %118, %v13_v2   ;;  %v14_v4 = vld [vmem:[%s192_s0 + $0x18] sm:$0xff]  ;;  %v15_v5 = vld [vmem:[%s192_s0 + $0x20] sm:$0xff] }
   0x3   :  { %v112_v6 = vld [vmem:[%s193_s1] ss:$0 sm:$0xff]  ;;  %v113_v7 = vld [vmem:[%s193_s1 + $0x1] ss:$0 sm:$0xff]  ;;  %v114_v23 = vld [vmem:[%s193_s1 + $0x2] ss:$0 sm:$0xff] }
   0x4   :  { %v115_v39 = vld [vmem:[%s193_s1 + $0x3] ss:$0 sm:$0xff] }
   0x6   :  { %27 = vperm.xlu0 %117, %v12_v3   ;;  %37 = vperm.xlu1 %118, %v14_v4  }
   0xa   :  { %42 = vperm.xlu0 %117, %v15_v5  }
  0x81   :  { %v23_v8 = vpop.permute.xlu0 %22  ;;  %v33_v9 = vpop.permute.xlu1 %32 }
  0x82   :  { %v49_v10 = vmul.f32 %v112_v6, %v23_v8  ;;  %v51_v11 = vmul.f32 %v112_v6, %v33_v9 }
  0x84   :  { %v58_v12 = vadd.f32 %v113_v7, %v49_v10  ;;  %v60_v13 = vadd.f32 %v113_v7, %v51_v11 }
  0x85   :  { %v28_v14 = vpop.permute.xlu0 %27  ;;  %v38_v15 = vpop.permute.xlu1 %37 }
  0x86   :  { %119 = vtanh.f32 %v58_v12  ;;  %v50_v16 = vmul.f32 %v112_v6, %v28_v14  ;;  %v52_v17 = vmul.f32 %v112_v6, %v38_v15 }
  0x87   :  { %121 = vtanh.f32 %v60_v13 }
  0x88   :  { %v59_v18 = vadd.f32 %v113_v7, %v50_v16  ;;  %v61_v19 = vadd.f32 %v113_v7, %v52_v17 }
  0x89   :  { %v43_v20 = vpop.permute.xlu0 %42 }
  0x8a   :  { %123 = vtanh.f32 %v59_v18  ;;  %v53_v21 = vmul.f32 %v112_v6, %v43_v20 }
  0x8b   :  { %125 = vtanh.f32 %v61_v19 }
  0x8c   :  { %v62_v22 = vadd.f32 %v113_v7, %v53_v21 }
  0x8e   :  { %127 = vtanh.f32 %v62_v22 }
  0x90   :  { %v120_v24 = vpop.eup %119 }
  0x91   :  { %v72_v25 = vmul.f32 %v120_v24, %v114_v23  ;;  %v122_v26 = vpop.eup %121 }
  0x92   :  { %v74_v31 = vmul.f32 %v122_v26, %v114_v23 }
  0x93   :  { %v78_v27 = vsel %vm77_vm0, %v72_v25, 0.0 }
  0x94   :  { %v124_v28 = vpop.eup %123  ;;  %79 = vadd.xlane.f32.xlu1 %v78_v27  ;;  %v84_v36 = vsel %vm77_vm0, %v74_v31, 0.0 }
  0x95   :  { %v126_v29 = vpop.eup %125  ;;  %v73_v30 = vmul.f32 %v124_v28, %v114_v23 }
  0x96   :  { %v75_v32 = vmul.f32 %v126_v29, %v114_v23 }
  0x97   :  { %v81_v33 = vsel %vm77_vm0, %v73_v30, 0.0 }
  0x98   :  { %v128_v34 = vpop.eup %127  ;;  %82 = vadd.xlane.f32.xlu0 %v81_v33  ;;  %v87_v35 = vsel %vm77_vm0, %v75_v32, 0.0 }
  0x99   :  { %88 = vadd.xlane.f32.xlu1 %v87_v35  ;;  %v76_v37 = vmul.f32 %v128_v34, %v114_v23 }
  0x9b   :  { %v90_v38 = vsel %vm77_vm0, %v76_v37, 0.0 }
  0x9c   :  { %85 = vadd.xlane.f32.xlu0 %v84_v36 }
  0xa0   :  { %91 = vadd.xlane.f32.xlu0 %v90_v38 }
 0x121   :  { %v80_v40 = vpop.xlane.xlu1 %79 }
 0x122   :  { %v97_v41 = vadd.f32 %v115_v39, %v80_v40 }
 0x124   :  { %103 = vst.msk [vmem:[%s194_s2] sm:$0xff] %vm102_vm1, %v97_v41 }
 0x125   :  { %v83_v42 = vpop.xlane.xlu0 %82 }
 0x126   :  { %v98_v43 = vadd.f32 %v115_v39, %v83_v42  ;;  %v89_v44 = vpop.xlane.xlu1 %88 }
 0x127   :  { %v100_v45 = vadd.f32 %v115_v39, %v89_v44 }
 0x128   :  { %104 = vst.msk [vmem:[%s194_s2 + $0x8] sm:$0xff] %vm102_vm1, %v98_v43 }
 0x129   :  { %106 = vst.msk [vmem:[%s194_s2 + $0x18] sm:$0xff] %vm102_vm1, %v100_v45  ;;  %v86_v46 = vpop.xlane.xlu0 %85 }
 0x12a   :  { %v99_v47 = vadd.f32 %v115_v39, %v86_v46 }
 0x12c   :  { %105 = vst.msk [vmem:[%s194_s2 + $0x10] sm:$0xff] %vm102_vm1, %v99_v47 }
 0x12d   :  { %v92_v48 = vpop.xlane.xlu0 %91 }
 0x12e   :  { %v101_v49 = vadd.f32 %v115_v39, %v92_v48 }
 0x130   :  { %107 = vst.msk [vmem:[%s194_s2 + $0x20] sm:$0xff] %vm102_vm1, %v101_v49 }

</bundles_post_ra>
